<compile_context>
chip_gen: v7x
topology: tpu7x:2x2x1
jax: 0.10.0
libtpu: 0.0.40
codegen_flags: <defaults>
</compile_context>

<pallas_src>
import functools
import math

import jax
import jax.numpy as jnp
from jax.experimental import pallas as pl
from jax.experimental.pallas import tpu as pltpu


def build_pe_table(d_model: int, max_len: int, dtype=jnp.float32) -> jnp.ndarray:
    """Deterministic sinusoidal table, identical to the PyTorch __init__."""
    position = jnp.arange(max_len, dtype=jnp.float32)[:, None]            # [L, 1]
    div_term = jnp.exp(
        jnp.arange(0, d_model, 2, dtype=jnp.float32)
        * (-math.log(10000.0) / d_model)
    )                                                                      # [D/2]
    pe = jnp.zeros((max_len, 1, d_model), dtype=jnp.float32)
    pe = pe.at[:, 0, 0::2].set(jnp.sin(position * div_term))
    pe = pe.at[:, 0, 1::2].set(jnp.cos(position * div_term))
    return pe.astype(dtype)


def _pos_enc_kernel(x_ref, pe_ref, *rest, p: float, training: bool,
                    batch: int, d_model: int):
    """x_ref: [ts, B*D]; pe_ref: [ts, D]; optional u_ref: [ts, B*D] f32 uniforms."""
    use_dropout = training and p > 0.0
    if use_dropout:
        u_ref, o_ref = rest
        scale = 1.0 / (1.0 - p)
        p_f = jnp.float32(p)
    else:
        (o_ref,) = rest

    D = d_model
    pe = pe_ref[...]                                     # [ts, D]

    if D % 128 == 0:
        # Statically unrolled per-batch slices: zero-cost ref views, wide
        # lane-aligned stores, no [ts, B*D] broadcast temporary.
        for b in range(batch):
            sl = slice(b * D, (b + 1) * D)
            y = x_ref[:, sl] + pe
            if use_dropout:
                keep = u_ref[:, sl] >= p_f               # keep prob = 1 - p
                y = jnp.where(keep, y * scale, jnp.zeros_like(y))
            o_ref[:, sl] = y.astype(o_ref.dtype)
    else:
        # B*D is a 128 multiple but D is not: broadcast pe across batch and do
        # one wide unmasked store of the whole slab.
        pe_wide = jnp.tile(pe, (1, batch)) if batch > 1 else pe
        y = x_ref[...] + pe_wide
        if use_dropout:
            keep = u_ref[...] >= p_f
            y = jnp.where(keep, y * scale, jnp.zeros_like(y))
        o_ref[...] = y.astype(o_ref.dtype)


def _choose_seq_tile(S: int, row_bytes: int, sublane_mult: int,
                     target_bytes: int) -> int:
    """Pick a sequence-tile size: multiple of sublane_mult, ~target_bytes/block."""
    if S <= sublane_mult:
        return S
    ts = max(sublane_mult, target_bytes // max(row_bytes, 1))
    ts = max(sublane_mult, (ts // sublane_mult) * sublane_mult)
    if ts >= S:
        return S
    return ts


def positional_encoding_forward(
    x: jnp.ndarray,
    pe: jnp.ndarray,
    *,
    p: float = 0.1,
    training: bool = False,
    rng_key=None,
    seq_tile: int | None = None,
    target_block_bytes: int = 4 * 1024 * 1024,   # ~4 MiB: safe under v7x VMEM,
    buffer_count: int | None = None,             # optional pipeline-depth sweep (v7x)
    donate_x: bool = False,
) -> jnp.ndarray:
    """x: [seq_len, batch, d_model]; pe: [max_len, 1, d_model]."""
    S, B, D = x.shape
    row = B * D
    use_dropout = bool(training) and float(p) > 0.0
    itemsize = x.dtype.itemsize

    pe_s = pe[:S, 0, :].astype(x.dtype)                  # [S, D]

    # Lane-density guard: narrow / misaligned rows → masked partial stores
    # dominate and XLA wins anyway; fall back to plain JAX.
    if row % 128 != 0:
        y = x + pe_s[:, None, :]
        if use_dropout:
            key = rng_key if rng_key is not None else jax.random.PRNGKey(0)
            keep = jax.random.bernoulli(key, 1.0 - float(p), x.shape)
            y = jnp.where(keep, y * (1.0 / (1.0 - float(p))),
                          jnp.zeros_like(y))
        return y.astype(x.dtype)

    # Lane-dense 2D slab (free row-major reshape).
    x2d = x.reshape(S, row)                              # [S, B*D]

    # dtype packing multiple: 8 for f32, 16 for bf16, 32 for int8/fp8.
    sub = max(8, 32 // itemsize)
    row_bytes = row * itemsize
    ts = seq_tile if seq_tile is not None else _choose_seq_tile(
        S, row_bytes, sub, target_block_bytes)
    assert ts == S or ts % sub == 0, (
        f"seq tile must be a multiple of {sub} (or full S)")
    grid = (pl.cdiv(S, ts),)

    kernel = functools.partial(
        _pos_enc_kernel, p=float(p), training=bool(training),
        batch=B, d_model=D,
    )

    def _slab_spec():
        if buffer_count is not None:
            return pl.BlockSpec((ts, row), lambda i: (i, 0),
                                pipeline_mode=pl.Buffered(buffer_count))
        return pl.BlockSpec((ts, row), lambda i: (i, 0))

    operands = [x2d, pe_s]
    in_specs = [_slab_spec(), pl.BlockSpec((ts, D), lambda i: (i, 0))]
    bytes_accessed = 2 * S * row * itemsize + S * D * itemsize
    flops = S * row

    if use_dropout:
        key = rng_key if rng_key is not None else jax.random.PRNGKey(0)
        u2d = jax.random.uniform(key, (S, row), dtype=jnp.float32)
        operands.append(u2d)
        in_specs.append(_slab_spec())
        bytes_accessed += S * row * 4
        flops += 2 * S * row

    aliases = {0: 0} if donate_x else {}

    out2d = pl.pallas_call(
        kernel,
        out_shape=jax.ShapeDtypeStruct((S, row), x.dtype),
        grid=grid,
        in_specs=in_specs,
        out_specs=_slab_spec(),
        compiler_params=pltpu.CompilerParams(
            dimension_semantics=("parallel",),     # shard seq tiles across TCs
            vmem_limit_bytes=48 * 1024 * 1024,     # headroom for 4 MiB blocks
        ),
        cost_estimate=pl.CostEstimate(
            flops=flops, transcendentals=0, bytes_accessed=bytes_accessed),
        input_output_aliases=aliases,
    )(*operands)

    return out2d.reshape(S, B, D)


if __name__ == "__main__":
    # Small shapes consistent with the module's forward: x [seq, batch, d_model].
    seq_len, batch, d_model = 8, 2, 128
    max_len = 64

    key = jax.random.PRNGKey(0)
    x = jax.random.normal(key, (seq_len, batch, d_model), dtype=jnp.float32)
    pe = build_pe_table(d_model, max_len)

    # --- Eval-mode forward (dropout is identity), matches module.eval(). ---
    out = positional_encoding_forward(x, pe, p=0.1, training=False)
    out = jax.block_until_ready(out)
    ref = x + pe[:seq_len]
    assert out.shape == (seq_len, batch, d_model)
    assert jnp.allclose(out, ref, atol=1e-6, rtol=1e-6), "eval mismatch vs reference"

    # --- Multi-tile grid path (partial last block). ---
    seq_len2 = 20
    x2 = jax.random.normal(jax.random.PRNGKey(1), (seq_len2, batch, d_model),
                           dtype=jnp.float32)
    out2 = positional_encoding_forward(x2, pe, p=0.1, training=False, seq_tile=8)
    out2 = jax.block_until_ready(out2)
    ref2 = x2 + pe[:seq_len2]
    assert jnp.allclose(out2, ref2, atol=1e-6, rtol=1e-6), "tiled eval mismatch"

    # --- Training-mode path (inverted dropout with host-side uniforms). ---
    # TODO(synk): PyTorch's dropout RNG stream cannot be reproduced bit-exactly;
    # correctness here is structural (entries are zeros or exactly-scaled).
    p_drop = 0.1
    out_train = positional_encoding_forward(
        x, pe, p=p_drop, training=True, rng_key=jax.random.PRNGKey(1234))
    out_train = jax.block_until_ready(out_train)
    scaled = ref * jnp.float32(1.0 / (1.0 - p_drop))
    structural_ok = jnp.all((out_train == 0) | (jnp.abs(out_train - scaled) < 1e-5))
    assert bool(structural_ok), "training-mode values are neither dropped nor scaled"

    # --- Narrow-row shape exercises the XLA fallback (lane-density guard). ---
    x3 = jax.random.normal(jax.random.PRNGKey(2), (seq_len, 2, 32), dtype=jnp.float32)
    pe3 = build_pe_table(32, max_len)
    out3 = jax.block_until_ready(
        positional_encoding_forward(x3, pe3, p=0.1, training=False))
    assert jnp.allclose(out3, x3 + pe3[:seq_len], atol=1e-6, rtol=1e-6)

    print("KERNEL_OK")
</pallas_src>

<mosaic_0001>
module attributes {stable_mosaic.version = 11 : i64} {
  func.func @_pos_enc_kernel(%arg0: i32, %arg1: memref<8x256xf32, #tpu.memory_space<vmem>>, %arg2: memref<8x128xf32, #tpu.memory_space<vmem>>, %arg3: memref<8x256xf32, #tpu.memory_space<vmem>>) attributes {dimension_semantics = [#tpu.dimension_semantics<parallel>], iteration_bounds = array<i64: 1>, scalar_prefetch = 0 : i64, scratch_operands = 0 : i64, tpu.core_type = #tpu.core_type<tc>, window_params = [{transform_indices = @transform_0, window_bounds = array<i64: 8, 256>}, {transform_indices = @transform_1, window_bounds = array<i64: 8, 128>}, {transform_indices = @transform_2, window_bounds = array<i64: 8, 256>}]} {
    %c0 = arith.constant 0 : index
    %c0_0 = arith.constant 0 : index
    %0 = vector.load %arg2[%c0, %c0_0] : memref<8x128xf32, #tpu.memory_space<vmem>>, vector<8x128xf32>
    %c0_1 = arith.constant 0 : index
    %c0_2 = arith.constant 0 : index
    %1 = vector.load %arg1[%c0_1, %c0_2] : memref<8x256xf32, #tpu.memory_space<vmem>>, vector<8x128xf32>
    %2 = arith.addf %1, %0 : vector<8x128xf32>
    %c0_3 = arith.constant 0 : index
    %c0_4 = arith.constant 0 : index
    %3 = vector.load %arg3[%c0_3, %c0_4] : memref<8x256xf32, #tpu.memory_space<vmem>>, vector<8x128xf32>
    tpu.vector_store %arg3[%c0_3, %c0_4], %2 {strides = array<i32>} : memref<8x256xf32, #tpu.memory_space<vmem>>, vector<8x128xf32>,
    %c0_5 = arith.constant 0 : index
    %c128 = arith.constant 128 : index
    %4 = vector.load %arg1[%c0_5, %c128] : memref<8x256xf32, #tpu.memory_space<vmem>>, vector<8x128xf32>
    %5 = arith.addf %4, %0 : vector<8x128xf32>
    %c0_6 = arith.constant 0 : index
    %c128_7 = arith.constant 128 : index
    %6 = vector.load %arg3[%c0_6, %c128_7] : memref<8x256xf32, #tpu.memory_space<vmem>>, vector<8x128xf32>
    tpu.vector_store %arg3[%c0_6, %c128_7], %5 {strides = array<i32>} : memref<8x256xf32, #tpu.memory_space<vmem>>, vector<8x128xf32>,
    return
  }
  func.func @transform_0(%arg0: i32) -> (i32, i32) {
    %c0_i32 = arith.constant 0 : i32
    %c0_i32_0 = arith.constant 0 : i32
    return %arg0, %c0_i32 : i32, i32
  }
  func.func @transform_1(%arg0: i32) -> (i32, i32) {
    %c0_i32 = arith.constant 0 : i32
    %c0_i32_0 = arith.constant 0 : i32
    return %arg0, %c0_i32 : i32, i32
  }
  func.func @transform_2(%arg0: i32) -> (i32, i32) {
    %c0_i32 = arith.constant 0 : i32
    %c0_i32_0 = arith.constant 0 : i32
    return %arg0, %c0_i32 : i32, i32
  }
}

</mosaic_0001>

<bundles_post_ra>
// kernel: tpu_custom_call.1
= control target key start
LH: loop header
LB: loop body
LE: loop exit
PB: predicated region body
PF: predicated region fallthrough
CT: control target
= control target key end

     0   :  { %7 = vsyncpa [#allocation3], 0  ;;  %s188_s0 = inlined_call_operand.hbm [shape: f32[8,256], index: 0, kind: input, shape index: {}]   ;;  %s189_s1 = inlined_call_operand.hbm [shape: f32[8,128], index: 1, kind: input, shape index: {}]   ;;  %s190_s2 = inlined_call_operand.hbm [shape: f32[8,256], index: 2, kind: output, shape index: {}]  }
   0x1   :  { %8 = vsyncpa [#allocation6], 0 }
   0x2   :  { %9 = vsyncpa [#allocation4], 0  ;;  %s134_s9 = smov [#allocation2]   ;;  %s135_s11 = smov [#allocation5]  }
   0x3   :  { %s16_s10 = sshll.u32 %s134_s9, 4  ;;  %s26_s12 = sshll.u32 %s135_s11, 4  ;;  %s17_s10 = int_to_ptr.vmem [resolvable:$true] %s16_s10  ;;  %s27_s12 = int_to_ptr.vmem [resolvable:$true] %s26_s12 }
   0x4   :  { %s62_s15 = scalar_lea.hbm %s188_s0, 256 }
   0x5   :  { %p63_p0 = scmp.ne.s32.totalorder %s188_s0, %s62_s15  ;;  %p66_p1 = scmp.lt.u32.totalorder %s62_s15, %s188_s0 }
   0x7   :  { %p68_p2 = pnand %p66_p1, %p63_p0 }
   0x9   :  { %71 = shalt.err (!%p68_p2)
}
   0xa   :  { %s72_s20 = scalar_lea.vmem %s17_s10, 256  ;;  %p77_p4 = scmp.lt.s32.totalorder %s17_s10, %s17_s10 }
   0xb   :  { %p73_p3 = scmp.ne.s32.totalorder %s17_s10, %s72_s20  ;;  %p78_p5 = scmp.lt.s32.totalorder %s72_s20, %s72_s20 }
   0xd   :  { %p79_p6 = por %p78_p5, %p77_p4 }
   0xf   :  { %p80_p7 = pnand %p79_p6, %p73_p3 }
  0x11   :  { %83 = shalt.err (!%p80_p7)
}
  0x12   :  { %19 = dma.hbm_to_vmem [thread:$0]  %s188_s0, 256, %s17_s10, [#allocation3]  }
  0x13   :  { %s84_s25 = scalar_lea.hbm %s189_s1, 128 }
  0x14   :  { %p85_p8 = scmp.ne.s32.totalorder %s189_s1, %s84_s25  ;;  %p88_p9 = scmp.lt.u32.totalorder %s84_s25, %s189_s1 }
  0x16   :  { %p90_p10 = pnand %p88_p9, %p85_p8 }
  0x18   :  { %93 = shalt.err (!%p90_p10)
}
  0x19   :  { %s94_s30 = scalar_lea.vmem %s27_s12, 128  ;;  %p99_p12 = scmp.lt.s32.totalorder %s27_s12, %s27_s12 }
  0x1a   :  { %p95_p11 = scmp.ne.s32.totalorder %s27_s12, %s94_s30  ;;  %p100_p13 = scmp.lt.s32.totalorder %s94_s30, %s94_s30 }
  0x1c   :  { %p101_p0 = por %p100_p13, %p99_p12 }
  0x1e   :  { %p102_p1 = pnand %p101_p0, %p95_p11 }
  0x20   :  { %105 = shalt.err (!%p102_p1)
}
  0x21   :  { %29 = dma.hbm_to_vmem [thread:$0]  %s189_s1, 128, %s27_s12, [#allocation6]  }
  0x22   :  { %128 = dma.done.wait [#allocation3], 256  }
  0x23   :  { %129 = vsyncadd [#allocation3], 4294967040 }
  0x24   :  { %130 = dma.done.wait [#allocation6], 128  }
  0x25   :  { %131 = vsyncadd [#allocation6], 4294967168  ;;  %s136_s4 = smov [#allocation7]   ;;  %v36_v0 = vld [vmem:[#allocation5] sm:$0xff]  ;;  %v37_v1 = vld [vmem:[#allocation2] sm:$0xff] }
  0x26   :  { %s49_s5 = sshll.u32 %s136_s4, 4  ;;  %v40_v2 = vld [vmem:[#allocation2 + $0x8] sm:$0xff]  ;;  %v38_v3 = vadd.f32 %v37_v1, %v36_v0  ;;  %s50_s5 = int_to_ptr.vmem [resolvable:$true] %s49_s5 }
  0x27   :  { %v41_v4 = vadd.f32 %v40_v2, %v36_v0  ;;  %s106_s6 = scalar_lea.vmem %s50_s5, 256  ;;  %p111_p3 = scmp.lt.s32.totalorder %s50_s5, %s50_s5 }
  0x28   :  { %39 = vst [vmem:[#allocation7] sm:$0xff] %v38_v3  ;;  %p107_p2 = scmp.ne.s32.totalorder %s50_s5, %s106_s6  ;;  %p112_p4 = scmp.lt.s32.totalorder %s106_s6, %s106_s6 }
  0x29   :  { %42 = vst [vmem:[#allocation7 + $0x8] sm:$0xff] %v41_v4 }
  0x2a   :  { %p113_p5 = por %p112_p4, %p111_p3 }
  0x2c   :  { %p114_p6 = pnand %p113_p5, %p107_p2 }
  0x2e   :  { %117 = shalt.err (!%p114_p6)
}
  0x2f   :  { %s118_s8 = scalar_lea.hbm %s190_s2, 256 }
  0x30   :  { %p119_p7 = scmp.ne.s32.totalorder %s190_s2, %s118_s8  ;;  %p122_p8 = scmp.lt.u32.totalorder %s118_s8, %s190_s2 }
  0x32   :  { %p124_p9 = pnand %p122_p8, %p119_p7 }
  0x34   :  { %127 = shalt.err (!%p124_p9)
}
  0x35   :  { %52 = dma.vmem_to_hbm [thread:$0]  %s50_s5, 256, %s190_s2, [#allocation4]  }
  0x36   :  { %132 = dma.done.wait [#allocation4], 256  }
  0x37   :  { %133 = vsyncadd [#allocation4], 4294967040 }
  0x38   :  { %56 = vsyncpa [#allocation3], 1 }
  0x39   :  { %57 = vsyncpa [#allocation6], 1 }
  0x3a   :  { %58 = vsyncpa [#allocation4], 1 }

</bundles_post_ra>
